<compile_context>
chip_gen: v7x
topology: tpu7x:2x2x1
jax: 0.10.0
libtpu: 0.0.40
codegen_flags: <defaults>
</compile_context>

<pallas_src>
import jax
import jax.numpy as jnp
from jax import lax
from jax.experimental import pallas as pl
from jax.experimental.pallas import tpu as pltpu


# ----------------------------------------------------------------------------
# kernel
# ----------------------------------------------------------------------------
def _make_block_kernel(TB, H, WC, WCo, mm_dtype):
    """Fused bn1->relu->conv1->bn2->relu->conv2->(+residual) on a lane-dense
    (TB, H, W*C) block of B = N*D depth slices.

    Each 3x3 conv is three H-tap matmuls against banded (W*Cin, W*Cout) weight
    matrices (W taps + channel mixing folded in by the wrapper).  Instead of an
    H-padded im2col scratch (store + reload), the tap results are computed from
    ONE aligned LHS and combined with per-slice row shifts of the f32 results,
    so every Ref access stays sublane-aligned and no scratch refs are needed.
    """
    M = TB * H

    def _conv3x3_htaps(lhs2d, w_ref, zrow):
        # lhs2d: (M, K) mm_dtype ; w_ref: (3, K, WCo) mm_dtype (resident)
        r0 = jnp.dot(lhs2d, w_ref[0], preferred_element_type=jnp.float32)
        r1 = jnp.dot(lhs2d, w_ref[1], preferred_element_type=jnp.float32)
        r2 = jnp.dot(lhs2d, w_ref[2], preferred_element_type=jnp.float32)
        r0 = r0.reshape(TB, H, WCo)
        r1 = r1.reshape(TB, H, WCo)
        r2 = r2.reshape(TB, H, WCo)
        # out[h] = r1[h] + r0[h-1] + r2[h+1], zero outside [0, H) per slice.
        up = jnp.concatenate([zrow, r0[:, :H - 1, :]], axis=1)
        dn = jnp.concatenate([r2[:, 1:, :], zrow], axis=1)
        return r1 + up + dn

    def kernel(x_ref, w1_ref, w2_ref, s1_ref, b1_ref, s2_ref, b2_ref, out_ref):
        x = x_ref[...].astype(jnp.float32)           # (TB, H, WC), f32 math
        s1 = s1_ref[0]                               # (WC,)
        b1 = b1_ref[0]
        s2 = s2_ref[0]                               # (WCo,)
        b2 = b2_ref[0]
        zrow = jnp.zeros((TB, 1, WCo), jnp.float32)

        # ---- bn1 + relu (VPU), single cast to the MXU feed dtype ----
        h1 = jnp.maximum(x * s1 + b1, 0.0).astype(mm_dtype).reshape(M, WC)

        # ---- conv1 (3 H-tap matmuls + result shifts) ----
        y1 = _conv3x3_htaps(h1, w1_ref, zrow)        # (TB, H, WCo) f32

        # ---- bn2 + relu ----
        h2 = jnp.maximum(y1 * s2 + b2, 0.0).astype(mm_dtype).reshape(M, WCo)

        # ---- conv2 ----
        y2 = _conv3x3_htaps(h2, w2_ref, zrow)        # (TB, H, WCo) f32

        # ---- residual add (f32) + lane-dense store (WCo == WC, asserted) ----
        out_ref[...] = (y2 + x).astype(out_ref.dtype)

    return kernel


# ----------------------------------------------------------------------------
# wrapper helpers
# ----------------------------------------------------------------------------
def _fold_bn(gamma, beta, mean, var, eps):
    scale = gamma / jnp.sqrt(var + eps)
    bias = beta - mean * scale
    return scale.astype(jnp.float32), bias.astype(jnp.float32)


def _banded_weight(w_hwio, W):
    """(3,3,Cin,Cout) HWIO conv weight -> (3, W*Cin, W*Cout) per-H-tap banded
    matrices.  Row index = w_in*Cin + ci ; col index = w_out*Cout + co.  The
    band encodes the 3 W-taps (zero at the W edges) and the channel mixing, so
    each H-tap of the conv is a single (M, W*Cin) @ (W*Cin, W*Cout) matmul."""
    kh, kw, Cin, Cout = w_hwio.shape
    w_in = jnp.arange(W)[:, None]                # (W, 1)
    w_out = jnp.arange(W)[None, :]               # (1, W)
    dw = w_in - w_out + (kw // 2)                # (W, W) tap index
    valid = (dw >= 0) & (dw < kw)
    dw_c = jnp.clip(dw, 0, kw - 1)
    g = w_hwio[:, dw_c, :, :]                    # (kh, W_in, W_out, Cin, Cout)
    g = jnp.where(valid[None, :, :, None, None], g, 0.0)
    g = jnp.transpose(g, (0, 1, 3, 2, 4))        # (kh, W_in, Cin, W_out, Cout)
    return g.reshape(kh, W * Cin, W * Cout).astype(jnp.float32)


def _vmem_capacity_bytes():
    """Physical VMEM per TensorCore (generation-aware): 128 MiB on v5e/v6e,
    64 MiB/TC on v7x.  Conservative fallback if the query is unavailable."""
    try:
        info = pltpu.get_tpu_info()
        for name in ("vmem_capacity_bytes", "vmem_size_bytes", "vmem_bytes"):
            v = getattr(info, name, None)
            if v:
                return int(v)
    except Exception:
        pass
    return 64 * 1024 * 1024


def _pick_tb(B, H, WC, WCo, in_bytes, out_bytes, mm_bytes, budget_bytes):
    """Slices-per-grid-step against the modeled VMEM budget.  Counts the
    double-buffered IO blocks plus the in-kernel value temporaries (f32 upcast
    of x, bn/relu results, 3 H-tap matmul results and their shifted sums, the
    mm_dtype LHS casts) that the compiler materializes in VMEM."""
    per_slice = (
        2 * H * WC * in_bytes                 # input block, double buffered
        + 2 * H * WCo * out_bytes             # output block, double buffered
        + 2 * H * max(WC, WCo) * mm_bytes     # mm_dtype LHS temporaries
        + 8 * H * max(WC, WCo) * 4            # f32 value temporaries / headroom
    )
    tb = max(1, budget_bytes // per_slice)
    # Keep >=4 grid steps when possible so BlockSpec double-buffering hides
    # prologue/epilogue DMA (and both v7x TensorCores get >=2 steps each), but
    # never shrink blocks below ~32 slices: a (32, H, 128) f32 block is already
    # >=256 KiB contiguous, ~85%+ of HBM roofline.
    tb = min(tb, max(32, pl.cdiv(B, 4)))
    return int(min(tb, B))


# ----------------------------------------------------------------------------
# public entry points
# ----------------------------------------------------------------------------
def pre_activation_block_aniso_ndhwc(x_ndhwc, w1_hwio, w2_hwio, bn1, bn2, *,
                                     eps=1e-5, stride=1, dilation=1,
                                     downsample=None, mm_dtype=jnp.bfloat16,
                                     out_dtype=None, tb=None):
    """Channels-last primary entry: x_ndhwc is (N, D, H, W, C) f32 or bf16.

    Preferred external contract: folding to the kernel's lane-dense
    (N*D, H, W*C) layout is a free reshape (adjacent-dim merges), so there are
    no full-tensor HBM transposes around the kernel.

    mm_dtype feeds the MXU (default bf16: f32 matmul is multi-pass on v6e and
    v7x has no native f32 MXU path; accumulation is always f32 via
    preferred_element_type).  Pass mm_dtype=jnp.float32 for exact-vs-f32-conv
    semantics.  out_dtype defaults to the input dtype (bf16 in/out halves HBM
    traffic for this HBM-bound block)."""
    assert stride == 1 and dilation == 1 and downsample is None, (
        "TODO(synk): stride>1 / dilation>1 / downsample branch not implemented")

    N, D, H, W, C = x_ndhwc.shape
    kh, kw, Cin, Cout = w1_hwio.shape
    assert (kh, kw, Cin) == (3, 3, C)
    assert w2_hwio.shape == (3, 3, Cout, Cout)
    assert C == Cout, "residual add requires inplanes == planes (downsample=None)"

    WC, WCo = W * C, W * Cout
    assert WC <= 4096 and WCo <= 4096, (
        "TODO(synk): banded-weight path assumes modest W*C; tile W for wider maps")

    if out_dtype is None:
        out_dtype = x_ndhwc.dtype

    s1, b1 = _fold_bn(*bn1, eps)
    s2, b2 = _fold_bn(*bn2, eps)
    # per-channel scale/bias tiled to the lane-dense (W*C) layout (idx = w*C + c)
    s1w = jnp.tile(s1, W)[None, :]
    b1w = jnp.tile(b1, W)[None, :]
    s2w = jnp.tile(s2, W)[None, :]
    b2w = jnp.tile(b2, W)[None, :]

    w1b = _banded_weight(w1_hwio, W).astype(mm_dtype)   # (3, W*C,  W*Cout)
    w2b = _banded_weight(w2_hwio, W).astype(mm_dtype)   # (3, W*Co, W*Cout)

    # free reshape (no HBM data movement): (N,D,H,W,C) -> (N*D, H, W*C)
    B = N * D
    xb = x_ndhwc.reshape(B, H, WC)

    in_bytes = xb.dtype.itemsize
    out_bytes = jnp.dtype(out_dtype).itemsize
    mm_bytes = jnp.dtype(mm_dtype).itemsize

    vmem_cap = _vmem_capacity_bytes()
    # Leave headroom for compiler-internal scratch: ~48 MiB on v7x (64 MiB/TC),
    # ~96 MiB on v5e/v6e (128 MiB).
    vmem_limit = int(min(vmem_cap * 3 // 4, 100 * 1024 * 1024))
    if tb is None:
        weight_bytes = int(w1b.size + w2b.size) * mm_bytes
        budget = max(1 << 20, vmem_limit - weight_bytes - 4 * 1024 * 1024)
        tb = _pick_tb(B, H, WC, WCo, in_bytes, out_bytes, mm_bytes, budget)
    tb = int(min(tb, B))
    # Ragged tail block handled by Pallas block masking — no wrapper-side
    # zero-pad copy of the input.  Garbage rows only feed discarded outputs.
    n_steps = pl.cdiv(B, tb)

    kernel = _make_block_kernel(tb, H, WC, WCo, mm_dtype)

    out = pl.pallas_call(
        kernel,
        out_shape=jax.ShapeDtypeStruct((B, H, WCo), out_dtype),
        grid_spec=pltpu.PrefetchScalarGridSpec(
            num_scalar_prefetch=0,
            grid=(n_steps,),
            in_specs=[
                pl.BlockSpec((tb, H, WC), lambda b: (b, 0, 0)),     # x slices
                pl.BlockSpec((3, WC, WCo), lambda b: (0, 0, 0)),    # conv1 taps (resident)
                pl.BlockSpec((3, WCo, WCo), lambda b: (0, 0, 0)),   # conv2 taps (resident)
                pl.BlockSpec((1, WC), lambda b: (0, 0)),            # bn1 scale
                pl.BlockSpec((1, WC), lambda b: (0, 0)),            # bn1 bias
                pl.BlockSpec((1, WCo), lambda b: (0, 0)),           # bn2 scale
                pl.BlockSpec((1, WCo), lambda b: (0, 0)),           # bn2 bias
            ],
            out_specs=pl.BlockSpec((tb, H, WCo), lambda b: (b, 0, 0)),
        ),
        compiler_params=pltpu.CompilerParams(
            dimension_semantics=("parallel",),
            vmem_limit_bytes=vmem_limit),
    )(xb, w1b, w2b, s1w, b1w, s2w, b2w)

    return out.reshape(N, D, H, W, Cout)   # free reshape


def pre_activation_block_aniso(x_ncdhw, w1_hwio, w2_hwio, bn1, bn2, **kw):
    """PyTorch-layout (N, C, D, H, W) compatibility wrapper.

    NOTE: NCDHW <-> channels-last costs two full-tensor HBM transposes outside
    the kernel (comparable to the fused kernel's own HBM traffic).  Prefer
    `pre_activation_block_aniso_ndhwc` as the external contract in a model.
    TODO(synk): if NCDHW must stay external, fold the (C,W) swizzle into the
    kernel via a (1, C, TD, H, W) BlockSpec + in-kernel XLU transpose."""
    x_ndhwc = jnp.transpose(x_ncdhw, (0, 2, 3, 4, 1))
    out = pre_activation_block_aniso_ndhwc(x_ndhwc, w1_hwio, w2_hwio, bn1, bn2, **kw)
    return jnp.transpose(out, (0, 4, 1, 2, 3))


# ----------------------------------------------------------------------------
# pure-JAX reference
# ----------------------------------------------------------------------------
def _reference(x_ncdhw, w1_hwio, w2_hwio, bn1, bn2, eps=1e-5):
    N, C, D, H, W = x_ncdhw.shape
    s1, b1 = _fold_bn(*bn1, eps)
    s2, b2 = _fold_bn(*bn2, eps)
    xb = jnp.transpose(x_ncdhw, (0, 2, 3, 4, 1)).reshape(N * D, H, W, C)
    dn = ("NHWC", "HWIO", "NHWC")
    h = jnp.maximum(xb * s1 + b1, 0.0)
    h = lax.conv_general_dilated(h, w1_hwio, (1, 1), "SAME", dimension_numbers=dn)
    h = jnp.maximum(h * s2 + b2, 0.0)
    h = lax.conv_general_dilated(h, w2_hwio, (1, 1), "SAME", dimension_numbers=dn)
    h = h + xb
    return h.reshape(N, D, H, W, -1).transpose(0, 4, 1, 2, 3)


if __name__ == "__main__":
    # Small shapes consistent with the Conv3d NCDHW input.  W*C = 16*8 = 128
    # keeps the kernel's last dim exactly one lane-width wide.
    N, C, D, H, W = 2, 8, 3, 16, 16
    planes = C  # residual path requires inplanes == planes (downsample=None)

    key = jax.random.PRNGKey(0)
    ks = jax.random.split(key, 11)
    x = jax.random.normal(ks[0], (N, C, D, H, W), jnp.float32)

    # Conv3d weights are (out, in, 1, 3, 3) in PyTorch; build equivalent 2D
    # HWIO (3, 3, in, out) weights directly (deterministic synthetic init).
    w1 = jax.random.normal(ks[1], (3, 3, C, planes), jnp.float32) * 0.1
    w2 = jax.random.normal(ks[2], (3, 3, planes, planes), jnp.float32) * 0.1

    bn1 = (1.0 + 0.1 * jax.random.normal(ks[3], (C,), jnp.float32),      # gamma
           0.1 * jax.random.normal(ks[4], (C,), jnp.float32),            # beta
           0.1 * jax.random.normal(ks[5], (C,), jnp.float32),            # running_mean
           jax.random.uniform(ks[6], (C,), jnp.float32, 0.5, 1.5))       # running_var
    bn2 = (1.0 + 0.1 * jax.random.normal(ks[7], (planes,), jnp.float32),
           0.1 * jax.random.normal(ks[8], (planes,), jnp.float32),
           0.1 * jax.random.normal(ks[9], (planes,), jnp.float32),
           jax.random.uniform(ks[10], (planes,), jnp.float32, 0.5, 1.5))

    ref = _reference(x, w1, w2, bn1, bn2)

    # 1) f32 MXU path (exact semantics) through the NCDHW compatibility entry,
    #    with an explicit tb that does NOT divide B=6 to exercise the ragged
    #    tail block (no wrapper zero-pad).
    out_f32 = pre_activation_block_aniso(x, w1, w2, bn1, bn2,
                                         mm_dtype=jnp.float32, tb=4)
    out_f32 = jax.block_until_ready(out_f32)
    assert out_f32.shape == (N, planes, D, H, W)
    err = float(jnp.max(jnp.abs(out_f32 - ref)))
    assert err < 1e-3, f"f32 path max err {err}"

    # 2) default path: bf16 MXU feed (f32 accumulation), auto tb / VMEM budget.
    out_bf = pre_activation_block_aniso(x, w1, w2, bn1, bn2)
    out_bf = jax.block_until_ready(out_bf)
    err_bf = float(jnp.max(jnp.abs(out_bf - ref)))
    assert err_bf < 5e-2, f"bf16-mm path max err {err_bf}"

    # 3) channels-last primary entry (no HBM transposes) with bf16 activations
    #    in/out (HBM-bound block -> halved IO bytes).
    x_cl = jnp.transpose(x, (0, 2, 3, 4, 1)).astype(jnp.bfloat16)
    out_cl = pre_activation_block_aniso_ndhwc(x_cl, w1, w2, bn1, bn2)
    out_cl = jax.block_until_ready(out_cl)
    assert out_cl.shape == (N, D, H, W, planes)
    assert out_cl.dtype == jnp.bfloat16
    ref_cl = jnp.transpose(ref, (0, 2, 3, 4, 1))
    err_cl = float(jnp.max(jnp.abs(out_cl.astype(jnp.float32) - ref_cl)))
    assert err_cl < 2e-1, f"bf16-io path max err {err_cl}"

    print("KERNEL_OK")
</pallas_src>

<mosaic_0001>
module attributes {stable_mosaic.version = 11 : i64} {
  func.func @kernel(%arg0: i32, %arg1: memref<4x16x128xf32, #tpu.memory_space<vmem>>, %arg2: memref<3x128x128xf32, #tpu.memory_space<vmem>>, %arg3: memref<3x128x128xf32, #tpu.memory_space<vmem>>, %arg4: memref<1x128xf32, #tpu.memory_space<vmem>>, %arg5: memref<1x128xf32, #tpu.memory_space<vmem>>, %arg6: memref<1x128xf32, #tpu.memory_space<vmem>>, %arg7: memref<1x128xf32, #tpu.memory_space<vmem>>, %arg8: memref<4x16x128xf32, #tpu.memory_space<vmem>>) attributes {dimension_semantics = [#tpu.dimension_semantics<parallel>], iteration_bounds = array<i64: 2>, scalar_prefetch = 0 : i64, scratch_operands = 0 : i64, tpu.core_type = #tpu.core_type<tc>, window_params = [{transform_indices = @transform_0, window_bounds = array<i64: 4, 16, 128>}, {pipeline_mode = #tpu.pipeline_mode<synchronous>, transform_indices = @transform_1, window_bounds = array<i64: 3, 128, 128>}, {pipeline_mode = #tpu.pipeline_mode<synchronous>, transform_indices = @transform_2, window_bounds = array<i64: 3, 128, 128>}, {pipeline_mode = #tpu.pipeline_mode<synchronous>, transform_indices = @transform_3, window_bounds = array<i64: 1, 128>}, {pipeline_mode = #tpu.pipeline_mode<synchronous>, transform_indices = @transform_4, window_bounds = array<i64: 1, 128>}, {pipeline_mode = #tpu.pipeline_mode<synchronous>, transform_indices = @transform_5, window_bounds = array<i64: 1, 128>}, {pipeline_mode = #tpu.pipeline_mode<synchronous>, transform_indices = @transform_6, window_bounds = array<i64: 1, 128>}, {transform_indices = @transform_7, window_bounds = array<i64: 4, 16, 128>}]} {
    %c0 = arith.constant 0 : index
    %c0_0 = arith.constant 0 : index
    %c0_1 = arith.constant 0 : index
    %0 = vector.load %arg1[%c0, %c0_0, %c0_1] : memref<4x16x128xf32, #tpu.memory_space<vmem>>, vector<4x16x128xf32>
    %c0_2 = arith.constant 0 : index
    %c0_3 = arith.constant 0 : index
    %1 = vector.load %arg4[%c0_2, %c0_3] : memref<1x128xf32, #tpu.memory_space<vmem>>, vector<1x128xf32>
    %2 = vector.shape_cast %1 : vector<1x128xf32> to vector<128xf32>
    %c0_4 = arith.constant 0 : index
    %c0_5 = arith.constant 0 : index
    %3 = vector.load %arg5[%c0_4, %c0_5] : memref<1x128xf32, #tpu.memory_space<vmem>>, vector<1x128xf32>
    %4 = vector.shape_cast %3 : vector<1x128xf32> to vector<128xf32>
    %c0_6 = arith.constant 0 : index
    %c0_7 = arith.constant 0 : index
    %5 = vector.load %arg6[%c0_6, %c0_7] : memref<1x128xf32, #tpu.memory_space<vmem>>, vector<1x128xf32>
    %6 = vector.shape_cast %5 : vector<1x128xf32> to vector<128xf32>
    %c0_8 = arith.constant 0 : index
    %c0_9 = arith.constant 0 : index
    %7 = vector.load %arg7[%c0_8, %c0_9] : memref<1x128xf32, #tpu.memory_space<vmem>>, vector<1x128xf32>
    %8 = vector.shape_cast %7 : vector<1x128xf32> to vector<128xf32>
    %cst = arith.constant 0.000000e+00 : f32
    %9 = vector.broadcast %cst : f32 to vector<4x1x128xf32>
    %10 = vector.shape_cast %2 : vector<128xf32> to vector<1x1x128xf32>
    %11 = vector.broadcast %10 : vector<1x1x128xf32> to vector<4x16x128xf32>
    %12 = arith.mulf %0, %11 : vector<4x16x128xf32>
    %13 = vector.shape_cast %4 : vector<128xf32> to vector<1x1x128xf32>
    %14 = vector.broadcast %13 : vector<1x1x128xf32> to vector<4x16x128xf32>
    %15 = arith.addf %12, %14 : vector<4x16x128xf32>
    %cst_10 = arith.constant 0.000000e+00 : f32
    %16 = vector.broadcast %cst_10 : f32 to vector<4x16x128xf32>
    %17 = arith.maximumf %15, %16 : vector<4x16x128xf32>
    %18 = vector.shape_cast %17 : vector<4x16x128xf32> to vector<64x128xf32>
    %c0_11 = arith.constant 0 : index
    %c0_12 = arith.constant 0 : index
    %c0_13 = arith.constant 0 : index
    %19 = vector.load %arg2[%c0_11, %c0_12, %c0_13] : memref<3x128x128xf32, #tpu.memory_space<vmem>>, vector<1x128x128xf32>
    %20 = vector.shape_cast %19 : vector<1x128x128xf32> to vector<128x128xf32>
    %cst_14 = arith.constant dense<0.000000e+00> : vector<64x128xf32>
    %21 = tpu.matmul %18, %20, %cst_14 {dimension_numbers = #tpu.dot_dimension_numbers<[1], [0], [0], [1], [0, 0, 1, 1], [], []>} : vector<64x128xf32>, vector<128x128xf32>, vector<64x128xf32> -> vector<64x128xf32>
    %c1 = arith.constant 1 : index
    %c0_15 = arith.constant 0 : index
    %c0_16 = arith.constant 0 : index
    %22 = vector.load %arg2[%c1, %c0_15, %c0_16] : memref<3x128x128xf32, #tpu.memory_space<vmem>>, vector<1x128x128xf32>
    %23 = vector.shape_cast %22 : vector<1x128x128xf32> to vector<128x128xf32>
    %cst_17 = arith.constant dense<0.000000e+00> : vector<64x128xf32>
    %24 = tpu.matmul %18, %23, %cst_17 {dimension_numbers = #tpu.dot_dimension_numbers<[1], [0], [0], [1], [0, 0, 1, 1], [], []>} : vector<64x128xf32>, vector<128x128xf32>, vector<64x128xf32> -> vector<64x128xf32>
    %c2 = arith.constant 2 : index
    %c0_18 = arith.constant 0 : index
    %c0_19 = arith.constant 0 : index
    %25 = vector.load %arg2[%c2, %c0_18, %c0_19] : memref<3x128x128xf32, #tpu.memory_space<vmem>>, vector<1x128x128xf32>
    %26 = vector.shape_cast %25 : vector<1x128x128xf32> to vector<128x128xf32>
    %cst_20 = arith.constant dense<0.000000e+00> : vector<64x128xf32>
    %27 = tpu.matmul %18, %26, %cst_20 {dimension_numbers = #tpu.dot_dimension_numbers<[1], [0], [0], [1], [0, 0, 1, 1], [], []>} : vector<64x128xf32>, vector<128x128xf32>, vector<64x128xf32> -> vector<64x128xf32>
    %28 = vector.shape_cast %21 : vector<64x128xf32> to vector<4x16x128xf32>
    %29 = vector.shape_cast %24 : vector<64x128xf32> to vector<4x16x128xf32>
    %30 = vector.shape_cast %27 : vector<64x128xf32> to vector<4x16x128xf32>
    %31 = vector.extract_strided_slice %28 {offsets = [0, 0, 0], sizes = [4, 15, 128], strides = [1, 1, 1]} : vector<4x16x128xf32> to vector<4x15x128xf32>
    %32 = tpu.concatenate %9, %31 in 1 : vector<4x1x128xf32>, vector<4x15x128xf32> -> vector<4x16x128xf32>
    %33 = vector.extract_strided_slice %30 {offsets = [0, 1, 0], sizes = [4, 15, 128], strides = [1, 1, 1]} : vector<4x16x128xf32> to vector<4x15x128xf32>
    %34 = tpu.concatenate %33, %9 in 1 : vector<4x15x128xf32>, vector<4x1x128xf32> -> vector<4x16x128xf32>
    %35 = arith.addf %29, %32 : vector<4x16x128xf32>
    %36 = arith.addf %35, %34 : vector<4x16x128xf32>
    %37 = vector.shape_cast %6 : vector<128xf32> to vector<1x1x128xf32>
    %38 = vector.broadcast %37 : vector<1x1x128xf32> to vector<4x16x128xf32>
    %39 = arith.mulf %36, %38 : vector<4x16x128xf32>
    %40 = vector.shape_cast %8 : vector<128xf32> to vector<1x1x128xf32>
    %41 = vector.broadcast %40 : vector<1x1x128xf32> to vector<4x16x128xf32>
    %42 = arith.addf %39, %41 : vector<4x16x128xf32>
    %cst_21 = arith.constant 0.000000e+00 : f32
    %43 = vector.broadcast %cst_21 : f32 to vector<4x16x128xf32>
    %44 = arith.maximumf %42, %43 : vector<4x16x128xf32>
    %45 = vector.shape_cast %44 : vector<4x16x128xf32> to vector<64x128xf32>
    %c0_22 = arith.constant 0 : index
    %c0_23 = arith.constant 0 : index
    %c0_24 = arith.constant 0 : index
    %46 = vector.load %arg3[%c0_22, %c0_23, %c0_24] : memref<3x128x128xf32, #tpu.memory_space<vmem>>, vector<1x128x128xf32>
    %47 = vector.shape_cast %46 : vector<1x128x128xf32> to vector<128x128xf32>
    %cst_25 = arith.constant dense<0.000000e+00> : vector<64x128xf32>
    %48 = tpu.matmul %45, %47, %cst_25 {dimension_numbers = #tpu.dot_dimension_numbers<[1], [0], [0], [1], [0, 0, 1, 1], [], []>} : vector<64x128xf32>, vector<128x128xf32>, vector<64x128xf32> -> vector<64x128xf32>
    %c1_26 = arith.constant 1 : index
    %c0_27 = arith.constant 0 : index
    %c0_28 = arith.constant 0 : index
    %49 = vector.load %arg3[%c1_26, %c0_27, %c0_28] : memref<3x128x128xf32, #tpu.memory_space<vmem>>, vector<1x128x128xf32>
    %50 = vector.shape_cast %49 : vector<1x128x128xf32> to vector<128x128xf32>
    %cst_29 = arith.constant dense<0.000000e+00> : vector<64x128xf32>
    %51 = tpu.matmul %45, %50, %cst_29 {dimension_numbers = #tpu.dot_dimension_numbers<[1], [0], [0], [1], [0, 0, 1, 1], [], []>} : vector<64x128xf32>, vector<128x128xf32>, vector<64x128xf32> -> vector<64x128xf32>
    %c2_30 = arith.constant 2 : index
    %c0_31 = arith.constant 0 : index
    %c0_32 = arith.constant 0 : index
    %52 = vector.load %arg3[%c2_30, %c0_31, %c0_32] : memref<3x128x128xf32, #tpu.memory_space<vmem>>, vector<1x128x128xf32>
    %53 = vector.shape_cast %52 : vector<1x128x128xf32> to vector<128x128xf32>
    %cst_33 = arith.constant dense<0.000000e+00> : vector<64x128xf32>
    %54 = tpu.matmul %45, %53, %cst_33 {dimension_numbers = #tpu.dot_dimension_numbers<[1], [0], [0], [1], [0, 0, 1, 1], [], []>} : vector<64x128xf32>, vector<128x128xf32>, vector<64x128xf32> -> vector<64x128xf32>
    %55 = vector.shape_cast %48 : vector<64x128xf32> to vector<4x16x128xf32>
    %56 = vector.shape_cast %51 : vector<64x128xf32> to vector<4x16x128xf32>
    %57 = vector.shape_cast %54 : vector<64x128xf32> to vector<4x16x128xf32>
    %58 = vector.extract_strided_slice %55 {offsets = [0, 0, 0], sizes = [4, 15, 128], strides = [1, 1, 1]} : vector<4x16x128xf32> to vector<4x15x128xf32>
    %59 = tpu.concatenate %9, %58 in 1 : vector<4x1x128xf32>, vector<4x15x128xf32> -> vector<4x16x128xf32>
    %60 = vector.extract_strided_slice %57 {offsets = [0, 1, 0], sizes = [4, 15, 128], strides = [1, 1, 1]} : vector<4x16x128xf32> to vector<4x15x128xf32>
    %61 = tpu.concatenate %60, %9 in 1 : vector<4x15x128xf32>, vector<4x1x128xf32> -> vector<4x16x128xf32>
    %62 = arith.addf %56, %59 : vector<4x16x128xf32>
    %63 = arith.addf %62, %61 : vector<4x16x128xf32>
    %64 = arith.addf %63, %0 : vector<4x16x128xf32>
    %c0_34 = arith.constant 0 : index
    %c0_35 = arith.constant 0 : index
    %c0_36 = arith.constant 0 : index
    %65 = vector.load %arg8[%c0_34, %c0_35, %c0_36] : memref<4x16x128xf32, #tpu.memory_space<vmem>>, vector<4x16x128xf32>
    tpu.vector_store %arg8[%c0_34, %c0_35, %c0_36], %64 {strides = array<i32>} : memref<4x16x128xf32, #tpu.memory_space<vmem>>, vector<4x16x128xf32>,
    return
  }
  func.func @transform_0(%arg0: i32) -> (i32, i32, i32) {
    %c0_i32 = arith.constant 0 : i32
    %c0_i32_0 = arith.constant 0 : i32
    %c0_i32_1 = arith.constant 0 : i32
    return %arg0, %c0_i32, %c0_i32_0 : i32, i32, i32
  }
  func.func @transform_1(%arg0: i32) -> (i32, i32, i32) {
    %c0_i32 = arith.constant 0 : i32
    %c0_i32_0 = arith.constant 0 : i32
    %c0_i32_1 = arith.constant 0 : i32
    %c0_i32_2 = arith.constant 0 : i32
    return %c0_i32, %c0_i32_0, %c0_i32_1 : i32, i32, i32
  }
  func.func @transform_2(%arg0: i32) -> (i32, i32, i32) {
    %c0_i32 = arith.constant 0 : i32
    %c0_i32_0 = arith.constant 0 : i32
    %c0_i32_1 = arith.constant 0 : i32
    %c0_i32_2 = arith.constant 0 : i32
    return %c0_i32, %c0_i32_0, %c0_i32_1 : i32, i32, i32
  }
  func.func @transform_3(%arg0: i32) -> (i32, i32) {
    %c0_i32 = arith.constant 0 : i32
    %c0_i32_0 = arith.constant 0 : i32
    %c0_i32_1 = arith.constant 0 : i32
    return %c0_i32, %c0_i32_0 : i32, i32
  }
  func.func @transform_4(%arg0: i32) -> (i32, i32) {
    %c0_i32 = arith.constant 0 : i32
    %c0_i32_0 = arith.constant 0 : i32
    %c0_i32_1 = arith.constant 0 : i32
    return %c0_i32, %c0_i32_0 : i32, i32
  }
  func.func @transform_5(%arg0: i32) -> (i32, i32) {
    %c0_i32 = arith.constant 0 : i32
    %c0_i32_0 = arith.constant 0 : i32
    %c0_i32_1 = arith.constant 0 : i32
    return %c0_i32, %c0_i32_0 : i32, i32
  }
  func.func @transform_6(%arg0: i32) -> (i32, i32) {
    %c0_i32 = arith.constant 0 : i32
    %c0_i32_0 = arith.constant 0 : i32
    %c0_i32_1 = arith.constant 0 : i32
    return %c0_i32, %c0_i32_0 : i32, i32
  }
  func.func @transform_7(%arg0: i32) -> (i32, i32, i32) {
    %c0_i32 = arith.constant 0 : i32
    %c0_i32_0 = arith.constant 0 : i32
    %c0_i32_1 = arith.constant 0 : i32
    return %arg0, %c0_i32, %c0_i32_0 : i32, i32, i32
  }
}

</mosaic_0001>

<bundles_post_ra>
// kernel: tpu_custom_call.1
= control target key start
LH: loop header
LB: loop body
LE: loop exit
PB: predicated region body
PF: predicated region fallthrough
CT: control target
= control target key end

     0   :  { %12 = vsyncpa [#allocation3], 0  ;;  %s2782_s0 = inlined_call_operand.hbm [shape: f32[6,16,128], index: 0, kind: input, shape index: {}]   ;;  %s2783_s1 = inlined_call_operand.hbm [shape: f32[3,128,128], index: 1, kind: input, shape index: {}]   ;;  %s2784_s2 = inlined_call_operand.hbm [shape: f32[3,128,128], index: 2, kind: input, shape index: {}]   ;;  %s2785_s3 = inlined_call_operand.vmem [shape: f32[1,128], index: 3, kind: input, shape index: {}]   ;;  %s2786_s4 = inlined_call_operand.vmem [shape: f32[1,128], index: 4, kind: input, shape index: {}]   ;;  %s2787_s5 = inlined_call_operand.vmem [shape: f32[1,128], index: 5, kind: input, shape index: {}]   ;;  %s2788_s6 = inlined_call_operand.vmem [shape: f32[1,128], index: 6, kind: input, shape index: {}]   ;;  %s2789_s7 = inlined_call_operand.hbm [shape: f32[6,16,128], index: 7, kind: output, shape index: {}]  }
   0x1   :  { %14 = vsyncpa [#allocation3 + $0x1], 0 }
   0x2   :  { %15 = vsyncpa [#allocation6], 0 }
   0x3   :  { %16 = vsyncpa [#allocation4], 0 }
   0x4   :  { %18 = vsyncpa [#allocation4 + $0x1], 0  ;;  %s2372_s24 = smov 0   ;;  %s2374_s25 = smov 0  }
   0x5   :  { %s2376_s26 = smov 0   ;;  %s2378_s27 = smov 0  }
   0x6 LB: > { %s2393_s28 = sadd.s32 4294967295, %s2320_s27   ;;  %s1454_s29 = sadd.s32 4294967294, %s2320_s27   ;;  %s2320_s27 = sphi %s2378_s27, %s2813_s27   ;;  %s2316_s26 = sphi %s2376_s26, %s2817_s26   ;;  %s2312_s25 = sphi %s2374_s25, %s2816_s25   ;;  %s2308_s24 = sphi %s2372_s24, %s2815_s24  }
   0x7   : > { %s2397_s30 = sadd.s32 1, %s2320_s27   ;;  %s31_s8 = sadd.s32 1, %s2316_s26 }
   0x8   : > { %2796 = sst [smem:[#allocation12_spill]] %s2397_s30  ;;  %s28_s9 = ssub.s32 %s2320_s27, %s2397_s30 }
   0x9   : > { %p38_p0 = scmp.ne.s32.totalorder %s2316_s26, %s2312_s25  ;;  %p29_p1 = scmp.eq.s32.totalorder %s28_s9, 0 }
   0xa   : > { %p39_p2 = scmp.eq.s32.totalorder %s2320_s27, 0  ;;  %p44_p3 = scmp.ne.s32.totalorder %s2312_s25, %s2308_s24 }
   0xb   : > { %p2790_p4 = scmp.eq.s32.totalorder %s2393_s28, 0  ;;  %p194_p7 = scmp.eq.s32.totalorder %s2393_s28, 1 }
   0xc   : > { %s2409_s10 = scalar_select %p29_p1, %s2316_s26, %s31_s8  }
   0xd   : > { %p2411_p5 = por %p39_p2, %p38_p0  ;;  %p2417_p6 = por %p2790_p4, %p44_p3 }
   0xe   : > { %2797 = sst [smem:[#allocation13_spill]] %s2409_s10  ;;  %p200_p8 = scmp.eq.s32.totalorder %s1454_s29, 1 }
   0xf   : > { %s2798_s11 = scalar_select %p2411_p5, 1, 0 }
  0x10   : > { %s2799_s12 = scalar_select %p2417_p6, 1, 0 }
  0x11   : > { %p1455_p9 = scmp.ge.s32.totalorder %s2320_s27, 1  ;;  %p207_p10 = scmp.lt.s32.totalorder %s2320_s27, 3 }
  0x12   : > { %p2424_p11 = por %p194_p7, %p38_p0  ;;  %p2428_p12 = por %p200_p8, %p44_p3 }
  0x13   : > { %p2432_p13 = pnand %p1455_p9, %p207_p10  ;;  %s2322_s16 = smov [#allocation5]  }
  0x14   : > { %s2800_s13 = scalar_select %p2424_p11, 1, 0 }
  0x15   : > { %s2801_s14 = scalar_select %p2428_p12, 1, 0 }
  0x16   : > { %s2803_s15 = scalar_select %p2432_p13, 1, 0 }
  0x17   : > { %2802 = sst [smem:[#allocation14_spill]] %s2801_s14  ;;  %p2110_p1 = pneg %p2432_p13 }
  0x18   : > { %s219_s17 = sshll.u32 %s2322_s16, 4  ;;  %s2323_s19 = smov [#allocation7]   ;;  %s220_s17 = int_to_ptr.vmem [resolvable:$true] %s219_s17 }
  0x19   : > { %p2440_p2 = pnand %p2110_p1, %p2790_p4  ;;  %s232_s20 = sshll.u32 %s2323_s19, 4  ;;  %s2444_s20 = int_to_ptr.vmem [resolvable:$true] %s232_s20 }
  0x1a   : > { %s2166_s23 = scalar_lea.hbm %s2783_s1, 6144 }
  0x1b   : > { %p2167_p0 = scmp.ne.s32.totalorder %s2783_s1, %s2166_s23  ;;  %p2168_p3 = pneg %p2440_p2 }
  0x1c   : > { %p2173_p9 = scmp.lt.u32.totalorder %s2166_s23, %s2783_s1 }
  0x1d   : > { %p2169_p7 = pnand %p2168_p3, %p2167_p0 }
  0x1f   : > { %p2170_p8 = pneg %p2169_p7 }
  0x21   : > { %p2175_p10 = pnand %p2173_p9, %p2170_p8 }
  0x23   : > { %2178 = shalt.err (!%p2175_p10)
}
  0x24   : > { %s2179_s19 = scalar_lea.vmem %s220_s17, 6144  ;;  %p2187_p11 = scmp.lt.s32.totalorder %s220_s17, %s220_s17 }
  0x25   : > { %p2180_p1 = scmp.ne.s32.totalorder %s220_s17, %s2179_s19  ;;  %p2188_p6 = scmp.lt.s32.totalorder %s2179_s19, %s2179_s19 }
  0x27   : > { %p2182_p4 = pnand %p2180_p1, %p2168_p3  ;;  %p2189_p13 = por %p2188_p6, %p2187_p11 }
  0x29   : > { %p2183_p12 = pneg %p2182_p4 }
  0x2b   : > { %p2190_p5 = pnand %p2189_p13, %p2183_p12 }
  0x2d   : > { %2193 = shalt.err (!%p2190_p5)
}
  0x2e   : > { %s2324_s21 = smov 128   ;;  %s2325_s22 = smov 8  }
  0x2f   : > { %2113 = dma.hbm_to_vmem [thread:$0]  (!%p2440_p2), %s2783_s1, 6144, %s220_s17, [#allocation6], %s2324_s21, %s2324_s21, %s2325_s22  }
  0x30   : > { %s2194_s16 = scalar_lea.hbm %s2784_s2, 6144 }
  0x31   : > { %p2195_p4 = scmp.ne.s32.totalorder %s2784_s2, %s2194_s16  ;;  %p2201_p11 = scmp.lt.u32.totalorder %s2194_s16, %s2784_s2 }
  0x33   : > { %p2197_p5 = pnand %p2195_p4, %p2168_p3 }
  0x35   : > { %p2198_p6 = pneg %p2197_p5 }
  0x37   : > { %p2203_p12 = pnand %p2201_p11, %p2198_p6 }
  0x39   : > { %2206 = shalt.err (!%p2203_p12)
}
  0x3a   : > { %s2207_s17 = scalar_lea.vmem %s2444_s20, 6144  ;;  %p2215_p8 = scmp.lt.s32.totalorder %s2444_s20, %s2444_s20 }
  0x3b   : > { %p2208_p13 = scmp.ne.s32.totalorder %s2444_s20, %s2207_s17  ;;  %p2216_p9 = scmp.lt.s32.totalorder %s2207_s17, %s2207_s17 }
  0x3d   : > { %p2210_p0 = pnand %p2208_p13, %p2168_p3  ;;  %p2217_p10 = por %p2216_p9, %p2215_p8 }
  0x3f   : > { %p2211_p7 = pneg %p2210_p0 }
  0x41   : > { %p2218_p1 = pnand %p2217_p10, %p2211_p7 }
  0x43   : > { %2221 = shalt.err (!%p2218_p1)
}
  0x44   : > { %2116 = dma.hbm_to_vmem [thread:$0]  (!%p2440_p2), %s2784_s2, 6144, %s2444_s20, [#allocation6], %s2324_s21, %s2324_s21, %s2325_s22  }
  0x45   : > { %p1458_p4 = scmp.ge.s32.totalorder %s2320_s27, 2 }
  0x46   : > { %p2805_p3 = scmp.ne.s32.totalorder (!%p1458_p4), %s2798_s11, 0 }
  0x47   : > { %254 = sbr.rel (%p1458_p4) target bundleno = 113 (0x71), region = 40 }
  0x4e   : > { %257 = sbr.rel (!%p2805_p3) target bundleno = 113 (0x71), region = 44  ;;  %s258_s14 = sand.u32 (%p2805_p3), 1, %s2316_s26  }
  0x4f   : > { %s1460_s23 = sshll.u32 (%p2805_p3), %s2320_s27, 2  ;;  %s1459_s29 = sshll.u32 (%p2805_p3), %s258_s14, 6 }
  0x50   : > { %s264_s8 = ssub.s32 (%p2805_p3), 6, %s1460_s23  ;;  %s2503_s21 = scalar_lea.sflag (%p2805_p3), [#allocation3], %s258_s14 }
  0x51   : > { %p265_p5 = scmp.lt.s32.totalorder (%p2805_p3), %s264_s8, 4  ;;  %s262_s22 = scalar_lea.vmem (%p2805_p3), [#allocation2], %s1459_s29 }
  0x55   : > { %s2819_s8 = smov (!%p265_p5, %s264_s8), 4 }
  0x56   : > { %s2500_s18 = sshll.u32 %s2819_s8, 8 }
  0x57   : > { %s270_s20 = ssub.s32 1024, %s2500_s18 }
  0x58   : > { %271 = vsyncadd %s2503_s21, %s270_s20  ;;  %p1463_p2 = scmp.ne.s32.totalorder %s2500_s18, 0  ;;  %s1492_s11 = sshll.u32 %s2320_s27, 10 }
  0x59   : > { %s2511_s19 = scalar_lea.hbm %s2782_s0, %s1492_s11  ;;  %s278_s17 = sshll.u32 %s262_s22, 4  ;;  %s2513_s17 = int_to_ptr.vmem [resolvable:$true] %s278_s17 }
  0x5a   : > { %s2222_s30 = scalar_lea.hbm %s2511_s19, %s2500_s18  ;;  %s2226_s23 = scalar_lea.hbm %s2782_s0, 1536 }
  0x5b   : > { %p2223_p6 = scmp.ne.s32.totalorder %s2511_s19, %s2222_s30  ;;  %p2227_p13 = scmp.lt.u32.totalorder %s2511_s19, %s2782_s0 }
  0x5c   : > { %p2228_p0 = scmp.lt.u32.totalorder %s2226_s23, %s2222_s30  ;;  %p2230_p8 = scmp.lt.u32.totalorder %s2222_s30, %s2511_s19 }
  0x5d   : > { %p2224_p11 = pnand %p2223_p6, %p1463_p2 }
  0x5e   : > { %p2229_p7 = por %p2228_p0, %p2227_p13 }
  0x5f   : > { %p2225_p12 = pneg %p2224_p11 }
  0x60   : > { %p2231_p9 = por %p2230_p8, %p2229_p7 }
  0x62   : > { %p2232_p10 = pnand %p2231_p9, %p2225_p12 }
  0x64   : > { %2235 = shalt.err (!%p2232_p10)
}
  0x65   : > { %s2236_s20 = scalar_lea.vmem %s2513_s17, %s2500_s18  ;;  %s2326_s22 = smov [#allocation2]  }
  0x66   : > { %p2237_p1 = scmp.ne.s32.totalorder %s2513_s17, %s2236_s20  ;;  %s2240_s11 = sshll.u32 %s2326_s22, 4  ;;  %s2241_s11 = int_to_ptr.vmem [resolvable:$false] %s2240_s11 }
  0x67   : > { %s2242_s9 = scalar_lea.vmem %s2241_s11, 2048  ;;  %p2243_p6 = scmp.lt.s32.totalorder %s2513_s17, %s2241_s11 }
  0x68   : > { %p2238_p3 = pnand %p2237_p1, %p1463_p2  ;;  %p2244_p11 = scmp.lt.s32.totalorder %s2242_s9, %s2236_s20 }
  0x6a   : > { %p2239_p5 = pneg %p2238_p3  ;;  %p2245_p13 = por %p2244_p11, %p2243_p6 }
  0x6c   : > { %p2246_p0 = pnand %p2245_p13, %p2239_p5 }
  0x6e   : > { %2249 = shalt.err (!%p2246_p0)
}
  0x6f   : > { %s2327_s16 = smov 128   ;;  %s2328_s30 = smov 8  }
  0x70   : > { %284 = dma.hbm_to_vmem [thread:$0]  (%p1463_p2), %s2511_s19, %s2500_s18, %s2513_s17, %s2503_s21, %s2327_s16, %s2327_s16, %s2328_s30  }
  0x71 PF: > { %p2806_p12 = scmp.ne.s32.totalorder %s2803_s15, 0 }
  0x72   : > { %s2543_s10 = sand.u32 (!%p2806_p12), 1, %s2312_s25   ;;  %p2807_p7 = scmp.ne.s32.totalorder (!%p2806_p12), %s2799_s12, 0 }
  0x73   : > { %290 = sbr.rel (%p2806_p12) target bundleno = 711 (0x2c7), region = 48  ;;  %s1470_s14 = sshll.u32 (!%p2806_p12), %s2543_s10, 6 }
  0x74   : > { %s293_s23 = scalar_lea.sflag (!%p2806_p12), [#allocation3], %s2543_s10  ;;  %s2549_s29 = scalar_lea.vmem (!%p2806_p12), [#allocation2], %s1470_s14 }
  0x7a   : > { %2295 = dma.done.wait (%p2807_p7), %s293_s23, 1024  }
  0x7b   : > { %2297 = vsyncadd (%p2807_p7), %s293_s23, 4294966272  ;;  %p2808_p2 = scmp.eq.s32.totalorder %s2393_s28, 0 }
  0x7d   : > { %2299 = dma.done.wait (%p2808_p2), [#allocation6], 12288   ;;  %p2809_p8 = pmov %p2808_p2 }
  0x7e   : > { %v395_v0 = vld [vmem:[#allocation5] sm:$0xff]  ;;  %v396_v1 = vld [vmem:[#allocation5 + $0x8] sm:$0xff]  ;;  %v397_v5 = vld [vmem:[#allocation5 + $0x10] sm:$0xff]  ;;  %vm768_vm0 = vcmask 1040384   ;;  %vm801_vm1 = vcmask 1046528   ;;  %s2698_s22 = scalar_lea.vmem [#allocation8], %s1470_s14 }
  0x7f   : > { %2301 = vsyncadd (%p2809_p8), [#allocation6], 4294955008  ;;  %v517_v2 = vld [vmem:[#allocation5 + $0x80] sm:$0xff]  ;;  %v1908_v3 = vpack.c.bf16 %v396_v1, %v395_v0  ;;  %v518_v4 = vld [vmem:[#allocation5 + $0x88] sm:$0xff]  ;;  %s1340_s11 = scalar_lea.sflag [#allocation4], %s2543_s10  ;;  %p2810_p9 = scmp.ne.s32.totalorder %s2800_s13, 0 }
  0x80   : > { %v398_v6 = vld [vmem:[#allocation5 + $0x18] sm:$0xff]  ;;  %v1940_v7 = vpack.c.bf16 %v518_v4, %v517_v2  ;;  %v519_v9 = vld [vmem:[#allocation5 + $0x90] sm:$0xff]  ;;  %v399_v11 = vld [vmem:[#allocation5 + $0x20] sm:$0xff]  ;;  %s1479_s9 = sshll.u32 (%p2810_p9), %s2393_s28, 2 }
  0x81   : > { %v1912_v8 = vpack.c.bf16 %v398_v6, %v397_v5  ;;  %v520_v10 = vld [vmem:[#allocation5 + $0x98] sm:$0xff]  ;;  %1909 = vmatprep.subr.bf16.mxu0 %v1908_v3  ;;  %v400_v13 = vld [vmem:[#allocation5 + $0x28] sm:$0xff]  ;;  %v521_v14 = vld [vmem:[#allocation5 + $0xa0] sm:$0xff]  ;;  %s1348_s16 = ssub.s32 (%p2810_p9), 6, %s1479_s9 }
  0x82   : > { %v1944_v12 = vpack.c.bf16 %v520_v10, %v519_v9  ;;  %v522_v15 = vld [vmem:[#allocation5 + $0xa8] sm:$0xff]  ;;  %1911 = vmatpush3.bf16.msra.mxu0 %v1908_v3  ;;  %1941 = vmatprep.subr.bf16.mxu1 %v1940_v7  ;;  %v1916_v16 = vpack.c.bf16 %v400_v13, %v399_v11  ;;  %v401_v18 = vld [vmem:[#allocation5 + $0x30] sm:$0xff]  ;;  %v402_v19 = vld [vmem:[#allocation5 + $0x38] sm:$0xff]  ;;  %p1349_p10 = scmp.lt.s32.totalorder (%p2810_p9), %s1348_s16, 4 }
  0x83   : > { %1913 = vmatprep.subr.bf16.mxu0 %v1912_v8  ;;  %1943 = vmatpush3.bf16.msra.mxu1 %v1940_v7  ;;  %v1948_v17 = vpack.c.bf16 %v522_v15, %v521_v14  ;;  %v523_v20 = vld [vmem:[#allocation5 + $0xb0] sm:$0xff]  ;;  %v524_v21 = vld [vmem:[#allocation5 + $0xb8] sm:$0xff]  ;;  %v1920_v22 = vpack.c.bf16 %v402_v19, %v401_v18  ;;  %v403_v23 = vld [vmem:[#allocation5 + $0x40] sm:$0xff] }
  0x84   : > { %1945 = vmatprep.subr.bf16.mxu1 %v1944_v12  ;;  %v404_v24 = vld [vmem:[#allocation5 + $0x48] sm:$0xff]  ;;  %v1952_v25 = vpack.c.bf16 %v524_v21, %v523_v20  ;;  %v2560_v26 = vld [vmem:[%s2549_s29] sm:$0xff]  ;;  %v405_v35 = vld [vmem:[#allocation5 + $0x50] sm:$0xff] }
  0x85   : > { %v2565_v27 = vld [vmem:[%s2785_s3] ss:$0 sm:$0xff]  ;;  %v526_v30 = vld [vmem:[#allocation5 + $0xc8] sm:$0xff]  ;;  %v1924_v32 = vpack.c.bf16 %v404_v24, %v403_v23  ;;  %v406_v36 = vld [vmem:[#allocation5 + $0x58] sm:$0xff] }
  0x86   : > { %1915 = vmatpush3.bf16.msra.mxu0 %v1912_v8  ;;  %v2570_v28 = vld [vmem:[%s2786_s4] ss:$0 sm:$0xff]  ;;  %v365_v31 = vmul.f32 %v2565_v27, %v2560_v26  ;;  %v527_v37 = vld [vmem:[#allocation5 + $0xd0] sm:$0xff]  ;;  %v528_v38 = vld [vmem:[#allocation5 + $0xd8] sm:$0xff]  ;;  %v1928_v40 = vpack.c.bf16 %v406_v36, %v405_v35 }
  0x87   : > { %1917 = vmatprep.subr.bf16.mxu0 %v1916_v16  ;;  %1947 = vmatpush3.bf16.msra.mxu1 %v1944_v12  ;;  %v525_v29 = vld [vmem:[#allocation5 + $0xc0] sm:$0xff]  ;;  %v1960_v41 = vpack.c.bf16 %v528_v38, %v527_v37  ;;  %v408_v43 = vld [vmem:[#allocation5 + $0x68] sm:$0xff]  ;;  %v409_v49 = vld [vmem:[#allocation5 + $0x70] sm:$0xff] }
  0x88   : > { %1949 = vmatprep.subr.bf16.mxu1 %v1948_v17  ;;  %v379_v33 = vadd.f32 %v2570_v28, %v365_v31  ;;  %v1956_v34 = vpack.c.bf16 %v526_v30, %v525_v29  ;;  %v407_v42 = vld [vmem:[#allocation5 + $0x60] sm:$0xff]  ;;  %v530_v45 = vld [vmem:[#allocation5 + $0xe8] sm:$0xff]  ;;  %v410_v50 = vld [vmem:[#allocation5 + $0x78] sm:$0xff] }
  0x89   : > { %v529_v44 = vld [vmem:[#allocation5 + $0xe0] sm:$0xff]  ;;  %v2580_v46 = vld [vmem:[%s2549_s29 + $0x8] sm:$0xff]  ;;  %v1932_v47 = vpack.c.bf16 %v408_v43, %v407_v42  ;;  %v2583_v51 = vld [vmem:[%s2549_s29 + $0x10] sm:$0xff]  ;;  %v1936_v56 = vpack.c.bf16 %v410_v50, %v409_v49 }
  0x8a   : > { %1919 = vmatpush3.bf16.msra.mxu0 %v1916_v16  ;;  %v2575_v39 = vmax.f32 %v379_v33, 0.0  ;;  %v1964_v48 = vpack.c.bf16 %v530_v45, %v529_v44  ;;  %v531_v52 = vld [vmem:[#allocation5 + $0xf0] sm:$0xff]  ;;  %v532_v53 = vld [vmem:[#allocation5 + $0xf8] sm:$0xff]  ;;  %v366_v54 = vmul.f32 %v2565_v27, %v2580_v46  ;;  %v367_v57 = vmul.f32 %v2565_v27, %v2583_v51  ;;  %v2593_v58 = vld [vmem:[%s2549_s29 + $0x20] sm:$0xff] }
  0x8b   : > { %1921 = vmatprep.subr.bf16.mxu0 %v1920_v22  ;;  %1951 = vmatpush3.bf16.msra.mxu1 %v1948_v17  ;;  %v2588_v55 = vld [vmem:[%s2549_s29 + $0x18] sm:$0xff]  ;;  %v1968_v59 = vpack.c.bf16 %v532_v53, %v531_v52  ;;  %v639_v60 = vld [vmem:[#allocation5 + $0x100] sm:$0xff]  ;;  %v640_v61 = vld [vmem:[#allocation5 + $0x108] sm:$0xff]  ;;  %v369_v0 = vmul.f32 %v2565_v27, %v2593_v58 }
  0x8c   : > { %1953 = vmatprep.subr.bf16.mxu1 %v1952_v25  ;;  %1676 = vmatprep.mubr.f32.mxu0 %v2575_v39  ;;  %v380_v62 = vadd.f32 %v2570_v28, %v366_v54  ;;  %v368_v63 = vmul.f32 %v2565_v27, %v2588_v55  ;;  %v2601_v1 = vld [vmem:[%s2549_s29 + $0x28] sm:$0xff]  ;;  %v1972_v2 = vpack.c.bf16 %v640_v61, %v639_v60  ;;  %v2605_v4 = vld [vmem:[%s2549_s29 + $0x30] sm:$0xff]  ;;  %v642_v6 = vld [vmem:[#allocation5 + $0x118] sm:$0xff] }
  0x8d   : > { %1720 = vmatprep.mubr.f32.mxu1 %v2575_v39  ;;  %v381_v3 = vadd.f32 %v2570_v28, %v367_v57  ;;  %v641_v5 = vld [vmem:[#allocation5 + $0x110] sm:$0xff]  ;;  %v370_v9 = vmul.f32 %v2565_v27, %v2601_v1  ;;  %v383_v10 = vadd.f32 %v2570_v28, %v369_v0  ;;  %v371_v11 = vmul.f32 %v2565_v27, %v2605_v4  ;;  %v2616_v12 = vld [vmem:[%s2549_s29 + $0x38] sm:$0xff]  ;;  %v643_v15 = vld [vmem:[#allocation5 + $0x120] sm:$0xff] }
  0x8e   : > { %1923 = vmatpush3.bf16.msra.mxu0 %v1920_v22  ;;  %v2607_v7 = vmax.f32 %v380_v62, 0.0  ;;  %v382_v8 = vadd.f32 %v2570_v28, %v368_v63  ;;  %v1976_v13 = vpack.c.bf16 %v642_v6, %v641_v5  ;;  %v644_v16 = vld [vmem:[#allocation5 + $0x128] sm:$0xff]  ;;  %v372_v19 = vmul.f32 %v2565_v27, %v2616_v12  ;;  %v645_v23 = vld [vmem:[#allocation5 + $0x130] sm:$0xff]  ;;  %v646_v24 = vld [vmem:[#allocation5 + $0x138] sm:$0xff] }
  0x8f   : > { %1925 = vmatprep.subr.bf16.mxu0 %v1924_v32  ;;  %1955 = vmatpush3.bf16.msra.mxu1 %v1952_v25  ;;  %v389_v14 = vmax.f32 %v381_v3, 0.0  ;;  %v384_v18 = vadd.f32 %v2570_v28, %v370_v9  ;;  %v391_v20 = vmax.f32 %v383_v10, 0.0  ;;  %v385_v21 = vadd.f32 %v2570_v28, %v371_v11  ;;  %v647_v31 = vld [vmem:[#allocation5 + $0x140] sm:$0xff]  ;;  %v649_v35 = vld [vmem:[#allocation5 + $0x150] sm:$0xff]  ;;  %v650_v36 = vld [vmem:[#allocation5 + $0x158] sm:$0xff] }
  0x90   : > { %1957 = vmatprep.subr.bf16.mxu1 %v1956_v34  ;;  %v390_v17 = vmax.f32 %v382_v8, 0.0  ;;  %v1980_v22 = vpack.c.bf16 %v644_v16, %v643_v15  ;;  %v386_v29 = vadd.f32 %v2570_v28, %v372_v19  ;;  %v1984_v27 = vpack.c.bf16 %v646_v24, %v645_v23  ;;  %v651_v37 = vld [vmem:[#allocation5 + $0x160] sm:$0xff]  ;;  %v652_v38 = vld [vmem:[#allocation5 + $0x168] sm:$0xff]  ;;  %v654_v42 = vld [vmem:[#allocation5 + $0x178] sm:$0xff] }
  0x91   : > { %v392_v25 = vmax.f32 %v384_v18, 0.0  ;;  %v393_v30 = vmax.f32 %v385_v21, 0.0  ;;  %v1992_v28 = vpack.c.bf16 %v650_v36, %v649_v35  ;;  %v879_v44 = vld [vmem:[#allocation7 + $0x8] sm:$0xff]  ;;  %v1000_v45 = vld [vmem:[#allocation7 + $0x80] sm:$0xff]  ;;  %v880_v49 = vld [vmem:[#allocation7 + $0x10] sm:$0xff] }
  0x92   : > { %1927 = vmatpush3.bf16.msra.mxu0 %v1924_v32  ;;  %v648_v32 = vld [vmem:[#allocation5 + $0x148] sm:$0xff]  ;;  %v394_v33 = vmax.f32 %v386_v29, 0.0  ;;  %v881_v50 = vld [vmem:[#allocation7 + $0x18] sm:$0xff]  ;;  %v1002_v54 = vld [vmem:[#allocation7 + $0x90] sm:$0xff] }
  0x93   : > { %1929 = vmatprep.subr.bf16.mxu0 %v1928_v40  ;;  %1959 = vmatpush3.bf16.msra.mxu1 %v1956_v34  ;;  %v1988_v34 = vpack.c.bf16 %v648_v32, %v647_v31  ;;  %v2008_v53 = vpack.c.bf16 %v881_v50, %v880_v49  ;;  %v882_v57 = vld [vmem:[#allocation7 + $0x20] sm:$0xff]  ;;  %v883_v60 = vld [vmem:[#allocation7 + $0x28] sm:$0xff]  ;;  %v885_v3 = vld [vmem:[#allocation7 + $0x38] sm:$0xff] }
  0x94   : > { %1961 = vmatprep.subr.bf16.mxu1 %v1960_v41  ;;  %v1004_v61 = vld [vmem:[#allocation7 + $0xa0] sm:$0xff]  ;;  %v1005_v62 = vld [vmem:[#allocation7 + $0xa8] sm:$0xff]  ;;  %v2012_v63 = vpack.c.bf16 %v883_v60, %v882_v57  ;;  %v1006_v5 = vld [vmem:[#allocation7 + $0xb0] sm:$0xff] }
  0x95   : > { %v2044_v0 = vpack.c.bf16 %v1005_v62, %v1004_v61  ;;  %v1007_v6 = vld [vmem:[#allocation7 + $0xb8] sm:$0xff]  ;;  %v886_v9 = vld [vmem:[#allocation7 + $0x40] sm:$0xff]  ;;  %v887_v10 = vld [vmem:[#allocation7 + $0x48] sm:$0xff] }
  0x96   : > { %1931 = vmatpush3.bf16.msra.mxu0 %v1928_v40  ;;  %v1996_v40 = vpack.c.bf16 %v652_v38, %v651_v37  ;;  %v2048_v8 = vpack.c.bf16 %v1007_v6, %v1006_v5  ;;  %v1008_v11 = vld [vmem:[#allocation7 + $0xc0] sm:$0xff]  ;;  %v888_v16 = vld [vmem:[#allocation7 + $0x50] sm:$0xff]  ;;  %v891_v23 = vld [vmem:[#allocation7 + $0x68] sm:$0xff] }
  0x97   : > { %1933 = vmatprep.subr.bf16.mxu0 %v1932_v47  ;;  %1963 = vmatpush3.bf16.msra.mxu1 %v1960_v41  ;;  %v653_v41 = vld [vmem:[#allocation5 + $0x170] sm:$0xff]  ;;  %v1013_v29 = vld [vmem:[#allocation7 + $0xe8] sm:$0xff]  ;;  %v893_v31 = vld [vmem:[#allocation7 + $0x78] sm:$0xff] }
  0x98   : > { %1965 = vmatprep.subr.bf16.mxu1 %v1964_v48  ;;  %v2000_v43 = vpack.c.bf16 %v654_v42, %v653_v41  ;;  %v1010_v19 = vld [vmem:[#allocation7 + $0xd0] sm:$0xff]  ;;  %v1122_v36 = vld [vmem:[#allocation7 + $0x100] sm:$0xff] }
  0x9a   : > { %1935 = vmatpush3.bf16.msra.mxu0 %v1932_v47 }
  0x9b   : > { %1937 = vmatprep.subr.bf16.mxu0 %v1936_v56  ;;  %1967 = vmatpush3.bf16.msra.mxu1 %v1964_v48  ;;  %v1001_v48 = vld [vmem:[#allocation7 + $0x88] sm:$0xff] }
  0x9c   : > { %1969 = vmatprep.subr.bf16.mxu1 %v1968_v59  ;;  %v2036_v52 = vpack.c.bf16 %v1001_v48, %v1000_v45 }
  0x9e   : > { %1939 = vmatpush3.bf16.msra.mxu0 %v1936_v56  ;;  %v1003_v56 = vld [vmem:[#allocation7 + $0x98] sm:$0xff] }
  0x9f   : > { %1971 = vmatpush3.bf16.msra.mxu1 %v1968_v59  ;;  %1973 = vmatprep.subr.bf16.mxu0 %v1972_v2  ;;  %v2040_v59 = vpack.c.bf16 %v1003_v56, %v1002_v54 }
  0xa1   : > { %1677 = vmatmul.mubr.f32.vlgmr.msra.gmra.mrb[0].mxu0 %v2607_v7 }
  0xa2   : > { %1975 = vmatpush3.bf16.msra.mxu0 %v1972_v2  ;;  %1721 = vmatmul.mubr.f32.vlgmr.msra.gmra.mrb[0].mxu1 %v2607_v7  ;;  %v884_v2 = vld [vmem:[#allocation7 + $0x30] sm:$0xff] }
  0xa3   : > { %1977 = vmatprep.subr.bf16.mxu0 %v1976_v13  ;;  %1679 = vmatprep.mubr.f32.mxu0 %v389_v14 }
  0xa4   : > { %1723 = vmatprep.mubr.f32.mxu1 %v389_v14 }
  0xa5   : > { %1680 = vmatmul.mubr.f32.gmra.mrb[2].mxu0 %v390_v17 }
  0xa6   : > { %1979 = vmatpush3.bf16.msra.mxu0 %v1976_v13  ;;  %1682 = vmatprep.mubr.f32.mxu0 %v391_v20  ;;  %v1009_v13 = vld [vmem:[#allocation7 + $0xc8] sm:$0xff] }
  0xa7   : > { %1981 = vmatprep.subr.bf16.mxu0 %v1980_v22  ;;  %1724 = vmatmul.mubr.f32.gmra.mrb[2].mxu1 %v390_v17  ;;  %v2052_v15 = vpack.c.bf16 %v1009_v13, %v1008_v11 }
  0xa8   : > { %1726 = vmatprep.mubr.f32.mxu1 %v391_v20 }
  0xa9   : > { %1683 = vmatmul.mubr.f32.gmra.mrb[4].mxu0 %v392_v25 }
  0xaa   : > { %1983 = vmatpush3.bf16.msra.mxu0 %v1980_v22  ;;  %1685 = vmatprep.mubr.f32.mxu0 %v393_v30  ;;  %v890_v22 = vld [vmem:[#allocation7 + $0x60] sm:$0xff] }
  0xab   : > { %1985 = vmatprep.subr.bf16.mxu0 %v1984_v27  ;;  %1727 = vmatmul.mubr.f32.gmra.mrb[4].mxu1 %v392_v25  ;;  %v2028_v24 = vpack.c.bf16 %v891_v23, %v890_v22 }
  0xac   : > { %1729 = vmatprep.mubr.f32.mxu1 %v393_v30 }
  0xad   : > { %1686 = vmatmul.mubr.f32.gmra.mrb[6].mxu0 %v394_v33 }
  0xae   : > { %1987 = vmatpush3.bf16.msra.mxu0 %v1984_v27  ;;  %1764 = vmatprep.mubr.f32.mxu0 %v2575_v39  ;;  %v878_v39 = vld [vmem:[#allocation7] sm:$0xff]  ;;  %v892_v27 = vld [vmem:[#allocation7 + $0x70] sm:$0xff] }
  0xaf   : > { %1989 = vmatprep.subr.bf16.mxu0 %v1988_v34  ;;  %1730 = vmatmul.mubr.f32.gmra.mrb[6].mxu1 %v394_v33  ;;  %v2004_v47 = vpack.c.bf16 %v879_v44, %v878_v39  ;;  %v2032_v32 = vpack.c.bf16 %v893_v31, %v892_v27 }
  0xb1   : > { %2005 = vmatprep.subr.bf16.mxu1 %v2004_v47 }
  0xb2   : > { %1991 = vmatpush3.bf16.msra.mxu0 %v1988_v34  ;;  %2007 = vmatpush3.bf16.msra.mxu1 %v2004_v47  ;;  %v1015_v34 = vld [vmem:[#allocation7 + $0xf8] sm:$0xff] }
  0xb3   : > { %1993 = vmatprep.subr.bf16.mxu0 %v1992_v28  ;;  %2009 = vmatprep.subr.bf16.mxu1 %v2008_v53 }
  0xb6   : > { %1995 = vmatpush3.bf16.msra.mxu0 %v1992_v28  ;;  %2011 = vmatpush3.bf16.msra.mxu1 %v2008_v53  ;;  %v1123_v28 = vld [vmem:[#allocation7 + $0x108] sm:$0xff] }
  0xb7   : > { %1997 = vmatprep.subr.bf16.mxu0 %v1996_v40  ;;  %2013 = vmatprep.subr.bf16.mxu1 %v2012_v63  ;;  %v2627_v37 = vpack.c.bf16 %v1123_v28, %v1122_v36 }
  0xba   : > { %1999 = vmatpush3.bf16.msra.mxu0 %v1996_v40  ;;  %2015 = vmatpush3.bf16.msra.mxu1 %v2012_v63 }
  0xbb   : > { %2001 = vmatprep.subr.bf16.mxu0 %v2000_v43 }
  0xbe   : > { %2003 = vmatpush3.bf16.msra.mxu0 %v2000_v43 }
  0xbf   : > { %2037 = vmatprep.subr.bf16.mxu0 %v2036_v52 }
  0xc1   : > { %1765 = vmatmul.mubr.f32.vlgmr.msra.gmra.mrb[8].mxu0 %v2607_v7  ;;  %v2016_v7 = vpack.c.bf16 %v885_v3, %v884_v2 }
  0xc2   : > { %1767 = vmatprep.mubr.f32.mxu0 %v389_v14  ;;  %2039 = vmatpush3.bf16.msra.mxu0 %v2036_v52  ;;  %v2020_v14 = vpack.c.bf16 %v887_v10, %v886_v9 }
  0xc3   : > { %2041 = vmatprep.subr.bf16.mxu0 %v2040_v59  ;;  %2017 = vmatprep.subr.bf16.mxu1 %v2016_v7 }
  0xc4   : > { %2019 = vmatpush3.bf16.msra.mxu1 %v2016_v7 }
  0xc5   : > { %1768 = vmatmul.mubr.f32.gmra.mrb[10].mxu0 %v390_v17  ;;  %2021 = vmatprep.subr.bf16.mxu1 %v2020_v14  ;;  %v889_v17 = vld [vmem:[#allocation7 + $0x58] sm:$0xff] }
  0xc6   : > { %1770 = vmatprep.mubr.f32.mxu0 %v391_v20  ;;  %2043 = vmatpush3.bf16.msra.mxu0 %v2040_v59  ;;  %v2024_v18 = vpack.c.bf16 %v889_v17, %v888_v16  ;;  %v1011_v20 = vld [vmem:[#allocation7 + $0xd8] sm:$0xff] }
  0xc7   : > { %2045 = vmatprep.subr.bf16.mxu0 %v2044_v0  ;;  %v2056_v21 = vpack.c.bf16 %v1011_v20, %v1010_v19 }
  0xc8   : > { %2023 = vmatpush3.bf16.msra.mxu1 %v2020_v14 }
  0xc9   : > { %1771 = vmatmul.mubr.f32.gmra.mrb[12].mxu0 %v392_v25  ;;  %2025 = vmatprep.subr.bf16.mxu1 %v2024_v18  ;;  %v1012_v25 = vld [vmem:[#allocation7 + $0xe0] sm:$0xff] }
  0xca   : > { %1773 = vmatprep.mubr.f32.mxu0 %v393_v30  ;;  %2047 = vmatpush3.bf16.msra.mxu0 %v2044_v0  ;;  %v2060_v30 = vpack.c.bf16 %v1013_v29, %v1012_v25  ;;  %v2641_v25 = vld [vmem:[%s2787_s5] ss:$0 sm:$0xff] }
  0xcb   : > { %2049 = vmatprep.subr.bf16.mxu0 %v2048_v8 }
  0xcc   : > { %2027 = vmatpush3.bf16.msra.mxu1 %v2024_v18 }
  0xcd   : > { %1774 = vmatmul.mubr.f32.gmra.mrb[14].mxu0 %v394_v33  ;;  %2029 = vmatprep.subr.bf16.mxu1 %v2028_v24  ;;  %v1014_v33 = vld [vmem:[#allocation7 + $0xf0] sm:$0xff] }
  0xce   : > { %2051 = vmatpush3.bf16.msra.mxu0 %v2048_v8  ;;  %v2064_v35 = vpack.c.bf16 %v1015_v34, %v1014_v33 }
  0xcf   : > { %2053 = vmatprep.subr.bf16.mxu0 %v2052_v15 }
  0xd0   : > { %2031 = vmatpush3.bf16.msra.mxu1 %v2028_v24 }
  0xd1   : > { %2033 = vmatprep.subr.bf16.mxu1 %v2032_v32 }
  0xd2   : > { %2055 = vmatpush3.bf16.msra.mxu0 %v2052_v15 }
  0xd3   : > { %2057 = vmatprep.subr.bf16.mxu0 %v2056_v21 }
  0xd4   : > { %2035 = vmatpush3.bf16.msra.mxu1 %v2032_v32  ;;  %v2648_v32 = vld [vmem:[%s2788_s6] ss:$0 sm:$0xff] }
  0xd5   : > { %2069 = vmatprep.subr.bf16.mxu1 %v2627_v37 }
  0xd6   : > { %2059 = vmatpush3.bf16.msra.mxu0 %v2056_v21 }
  0xd7   : > { %2061 = vmatprep.subr.bf16.mxu0 %v2060_v30 }
  0xda   : > { %2063 = vmatpush3.bf16.msra.mxu0 %v2060_v30 }
  0xdb   : > { %2065 = vmatprep.subr.bf16.mxu0 %v2064_v35 }
  0xde   : > { %2067 = vmatpush3.bf16.msra.mxu0 %v2064_v35 }
 0x174   : > { %v1678_v38 = vpop.f32.mrb[0].mxu0 }
 0x175   : > { %v770_v40 = vrot.slane %v1678_v38, 7  ;;  %v477_v41 = vpop.f32.mrb[1].mxu0  ;;  %v1722_v42 = vpop.f32.mrb[0].mxu1 }
 0x176   : > { %v769_v43 = vrot.slane %v477_v41, 7  ;;  %v599_v39 = vpop.f32.mrb[1].mxu1 }
 0x178   : > { %v771_v44 = vsel %vm768_vm0, %v769_v43, %v770_v40  ;;  %v789_v45 = vsel %vm768_vm0, 0.0, %v769_v43  ;;  %v1681_v47 = vpop.f32.mrb[2].mxu0 }
 0x179   : > { %v827_v48 = vadd.f32 %v1722_v42, %v771_v44  ;;  %v826_v49 = vadd.f32 %v789_v45, %v599_v39  ;;  %v773_v50 = vrot.slane %v1681_v47, 7  ;;  %v487_v52 = vpop.f32.mrb[3].mxu0  ;;  %v1124_v44 = vld [vmem:[#allocation7 + $0x110] sm:$0xff]  ;;  %v1125_v45 = vld [vmem:[#allocation7 + $0x118] sm:$0xff] }
 0x17a   : > { %v772_v53 = vrot.slane %v487_v52, 7  ;;  %v1725_v54 = vpop.f32.mrb[2].mxu1 }
 0x17b   : > { %v609_v56 = vpop.f32.mrb[3].mxu1 }
 0x17c   : > { %v774_v57 = vsel %vm768_vm0, %v772_v53, %v773_v50  ;;  %v1684_v59 = vpop.f32.mrb[4].mxu0  ;;  %v790_v60 = vsel %vm768_vm0, 0.0, %v772_v53 }
 0x17d   : > { %v829_v61 = vadd.f32 %v1725_v54, %v774_v57  ;;  %v776_v62 = vrot.slane %v1684_v59, 7  ;;  %v828_v63 = vadd.f32 %v790_v60, %v609_v56  ;;  %v497_v0 = vpop.f32.mrb[5].mxu0  ;;  %v2072_v59 = vpack.c.bf16 %v1125_v45, %v1124_v44  ;;  %v1137_v44 = vld [vmem:[#allocation7 + $0x178] sm:$0xff] }
 0x17e   : > { %v775_v2 = vrot.slane %v497_v0, 7  ;;  %v1728_v3 = vpop.f32.mrb[4].mxu1 }
 0x17f   : > { %v619_v5 = vpop.f32.mrb[5].mxu1 }
 0x180   : > { %v777_v6 = vsel %vm768_vm0, %v775_v2, %v776_v62  ;;  %v1687_v7 = vpop.f32.mrb[6].mxu0  ;;  %v791_v8 = vsel %vm768_vm0, 0.0, %v775_v2  ;;  %v1126_v2 = vld [vmem:[#allocation7 + $0x120] sm:$0xff] }
 0x181   : > { %v831_v9 = vadd.f32 %v1728_v3, %v777_v6  ;;  %v779_v10 = vrot.slane %v1687_v7, 7  ;;  %v830_v11 = vadd.f32 %v791_v8, %v619_v5  ;;  %v507_v13 = vpop.f32.mrb[7].mxu0  ;;  %v1127_v3 = vld [vmem:[#allocation7 + $0x128] sm:$0xff] }
 0x182   : > { %v778_v14 = vrot.slane %v507_v13, 7  ;;  %v1731_v15 = vpop.f32.mrb[6].mxu1 }
 0x183   : > { %v629_v16 = vpop.f32.mrb[7].mxu1 }
 0x184   : > { %v780_v17 = vsel %vm768_vm0, %v778_v14, %v779_v10  ;;  %v792_v18 = vsel %vm768_vm0, 0.0, %v778_v14 }
 0x185   : > { %v833_v19 = vadd.f32 %v1731_v15, %v780_v17  ;;  %v832_v20 = vadd.f32 %v792_v18, %v629_v16  ;;  %v2076_v15 = vpack.c.bf16 %v1127_v3, %v1126_v2 }
 0x194   : > { %v1766_v21 = vpop.f32.mrb[8].mxu0 }
 0x195   : > { %v803_v22 = vrot.slane %v1766_v21, 1  ;;  %v721_v23 = vpop.f32.mrb[9].mxu0 }
 0x196   : > { %v802_v24 = vrot.slane %v721_v23, 1 }
 0x197   : > { %v822_v29 = vsel %vm801_vm1, %v803_v22, 0.0 }
 0x198   : > { %v835_v30 = vadd.f32 %v827_v48, %v822_v29  ;;  %v804_v27 = vsel %vm801_vm1, %v802_v24, %v803_v22  ;;  %v1769_v31 = vpop.f32.mrb[10].mxu0  ;;  %v1128_v24 = vld [vmem:[#allocation7 + $0x130] sm:$0xff]  ;;  %v1129_v29 = vld [vmem:[#allocation7 + $0x138] sm:$0xff] }
 0x199   : > { %v834_v33 = vadd.f32 %v826_v49, %v804_v27  ;;  %v806_v34 = vrot.slane %v1769_v31, 1  ;;  %v731_v35 = vpop.f32.mrb[11].mxu0  ;;  %v2080_v31 = vpack.c.bf16 %v1129_v29, %v1128_v24 }
 0x19a   : > { %v849_v36 = vmul.f32 %v2641_v25, %v835_v30  ;;  %v805_v28 = vrot.slane %v731_v35, 1  ;;  %v1131_v35 = vld [vmem:[#allocation7 + $0x148] sm:$0xff] }
 0x19b   : > { %v823_v38 = vsel %vm801_vm1, %v806_v34, 0.0  ;;  %v848_v40 = vmul.f32 %v2641_v25, %v834_v33 }
 0x19c   : > { %v863_v41 = vadd.f32 %v2648_v32, %v849_v36  ;;  %v837_v42 = vadd.f32 %v829_v61, %v823_v38  ;;  %v807_v43 = vsel %vm801_vm1, %v805_v28, %v806_v34  ;;  %v1772_v39 = vpop.f32.mrb[12].mxu0  ;;  %v1130_v34 = vld [vmem:[#allocation7 + $0x140] sm:$0xff] }
 0x19d   : > { %v836_v47 = vadd.f32 %v828_v63, %v807_v43  ;;  %v809_v48 = vrot.slane %v1772_v39, 1  ;;  %v741_v49 = vpop.f32.mrb[13].mxu0  ;;  %v862_v50 = vadd.f32 %v2648_v32, %v848_v40  ;;  %v2084_v38 = vpack.c.bf16 %v1131_v35, %v1130_v34  ;;  %v1133_v40 = vld [vmem:[#allocation7 + $0x158] sm:$0xff]  ;;  %v1136_v39 = vld [vmem:[#allocation7 + $0x170] sm:$0xff] }
 0x19e   : > { %v851_v52 = vmul.f32 %v2641_v25, %v837_v42  ;;  %v808_v53 = vrot.slane %v741_v49, 1  ;;  %v2661_v60 = vmax.f32 %v863_v41, 0.0  ;;  %v1134_v41 = vld [vmem:[#allocation7 + $0x160] sm:$0xff]  ;;  %v1135_v42 = vld [vmem:[#allocation7 + $0x168] sm:$0xff]  ;;  %v2096_v45 = vpack.c.bf16 %v1137_v44, %v1136_v39 }
 0x19f   : > { %v824_v54 = vsel %vm801_vm1, %v809_v48, 0.0  ;;  %v2658_v56 = vmax.f32 %v862_v50, 0.0  ;;  %v850_v57 = vmul.f32 %v2641_v25, %v836_v47  ;;  %v2092_v43 = vpack.c.bf16 %v1135_v42, %v1134_v41 }
 0x1a0   : > { %v839_v61 = vadd.f32 %v831_v9, %v824_v54  ;;  %v810_v62 = vsel %vm801_vm1, %v808_v53, %v809_v48  ;;  %v1775_v63 = vpop.f32.mrb[14].mxu0  ;;  %v865_v0 = vadd.f32 %v2648_v32, %v851_v52 }
 0x1a1   : > { %v838_v5 = vadd.f32 %v830_v11, %v810_v62  ;;  %v812_v6 = vrot.slane %v1775_v63, 1  ;;  %v751_v7 = vpop.f32.mrb[15].mxu0  ;;  %1808 = vmatprep.mubr.f32.mxu1 %v2658_v56  ;;  %1852 = vmatprep.mubr.f32.mxu0 %v2658_v56  ;;  %v864_v8 = vadd.f32 %v2648_v32, %v850_v57 }
 0x1a2   : > { %v853_v10 = vmul.f32 %v2641_v25, %v839_v61  ;;  %v811_v13 = vrot.slane %v751_v7, 1  ;;  %1809 = vmatmul.mubr.f32.vlgmr.msra.gmra.mrb[8].mxu1 %v2661_v60  ;;  %1853 = vmatmul.mubr.f32.vlgmr.msra.gmra.mrb[16].mxu0 %v2661_v60  ;;  %v873_v18 = vmax.f32 %v865_v0, 0.0 }
 0x1a3   : > { %v825_v9 = vsel %vm801_vm1, %v812_v6, 0.0  ;;  %2071 = vmatpush3.bf16.msra.mxu1 %v2627_v37  ;;  %v872_v11 = vmax.f32 %v864_v8, 0.0  ;;  %v852_v14 = vmul.f32 %v2641_v25, %v838_v5 }
 0x1a4   : > { %v841_v16 = vadd.f32 %v833_v19, %v825_v9  ;;  %v813_v17 = vsel %vm801_vm1, %v811_v13, %v812_v6  ;;  %2073 = vmatprep.subr.bf16.mxu1 %v2072_v59  ;;  %v867_v21 = vadd.f32 %v2648_v32, %v853_v10 }
 0x1a5   : > { %v840_v22 = vadd.f32 %v832_v20, %v813_v17  ;;  %1811 = vmatprep.mubr.f32.mxu1 %v872_v11  ;;  %1855 = vmatprep.mubr.f32.mxu0 %v872_v11  ;;  %v866_v23 = vadd.f32 %v2648_v32, %v852_v14 }
 0x1a6   : > { %v855_v37 = vmul.f32 %v2641_v25, %v841_v16  ;;  %1812 = vmatmul.mubr.f32.gmra.mrb[10].mxu1 %v873_v18  ;;  %1856 = vmatmul.mubr.f32.gmra.mrb[18].mxu0 %v873_v18  ;;  %v875_v27 = vmax.f32 %v867_v21, 0.0 }
 0x1a7   : > { %2075 = vmatpush3.bf16.msra.mxu1 %v2072_v59  ;;  %v874_v30 = vmax.f32 %v866_v23, 0.0  ;;  %v854_v19 = vmul.f32 %v2641_v25, %v840_v22  ;;  %v1132_v25 = vld [vmem:[#allocation7 + $0x150] sm:$0xff] }
 0x1a8   : > { %2077 = vmatprep.subr.bf16.mxu1 %v2076_v15  ;;  %v869_v33 = vadd.f32 %v2648_v32, %v855_v37 }
 0x1a9   : > { %1814 = vmatprep.mubr.f32.mxu1 %v874_v30  ;;  %1858 = vmatprep.mubr.f32.mxu0 %v874_v30  ;;  %v868_v20 = vadd.f32 %v2648_v32, %v854_v19  ;;  %v2088_v32 = vpack.c.bf16 %v1133_v40, %v1132_v25 }
 0x1aa   : > { %1815 = vmatmul.mubr.f32.gmra.mrb[12].mxu1 %v875_v27  ;;  %1859 = vmatmul.mubr.f32.gmra.mrb[20].mxu0 %v875_v27  ;;  %v877_v28 = vmax.f32 %v869_v33, 0.0 }
 0x1ab   : > { %2079 = vmatpush3.bf16.msra.mxu1 %v2076_v15  ;;  %v876_v36 = vmax.f32 %v868_v20, 0.0 }
 0x1ac   : > { %2081 = vmatprep.subr.bf16.mxu1 %v2080_v31 }
 0x1ad   : > { %1817 = vmatprep.mubr.f32.mxu1 %v876_v36  ;;  %1861 = vmatprep.mubr.f32.mxu0 %v876_v36 }
 0x1ae   : > { %1818 = vmatmul.mubr.f32.gmra.mrb[14].mxu1 %v877_v28  ;;  %1862 = vmatmul.mubr.f32.gmra.mrb[22].mxu0 %v877_v28 }
 0x1af   : > { %2083 = vmatpush3.bf16.msra.mxu1 %v2080_v31  ;;  %1896 = vmatprep.mubr.f32.mxu1 %v2658_v56 }
 0x1b0   : > { %2085 = vmatprep.subr.bf16.mxu1 %v2084_v38 }
 0x1b3   : > { %2087 = vmatpush3.bf16.msra.mxu1 %v2084_v38 }
 0x1b4   : > { %2089 = vmatprep.subr.bf16.mxu1 %v2088_v32 }
 0x1b7   : > { %2091 = vmatpush3.bf16.msra.mxu1 %v2088_v32 }
 0x1b8   : > { %2093 = vmatprep.subr.bf16.mxu1 %v2092_v43 }
 0x1bb   : > { %2095 = vmatpush3.bf16.msra.mxu1 %v2092_v43 }
 0x1bc   : > { %2097 = vmatprep.subr.bf16.mxu1 %v2096_v45 }
 0x1bf   : > { %2099 = vmatpush3.bf16.msra.mxu1 %v2096_v45 }
 0x1c2   : > { %1897 = vmatmul.mubr.f32.vlgmr.msra.gmra.mrb[16].mxu1 %v2661_v60 }
 0x1c3   : > { %1899 = vmatprep.mubr.f32.mxu1 %v872_v11 }
 0x1c6   : > { %1900 = vmatmul.mubr.f32.gmra.mrb[18].mxu1 %v873_v18 }
 0x1c7   : > { %1902 = vmatprep.mubr.f32.mxu1 %v874_v30 }
 0x1ca   : > { %1903 = vmatmul.mubr.f32.gmra.mrb[20].mxu1 %v875_v27 }
 0x1cb   : > { %1905 = vmatprep.mubr.f32.mxu1 %v876_v36 }
 0x1ce   : > { %1906 = vmatmul.mubr.f32.gmra.mrb[22].mxu1 %v877_v28 }
 0x275   : > { %v1810_v47 = vpop.f32.mrb[8].mxu1  ;;  %v1854_v48 = vpop.f32.mrb[16].mxu0 }
 0x276   : > { %v1252_v49 = vrot.slane %v1810_v47, 7  ;;  %v960_v50 = vpop.f32.mrb[9].mxu1  ;;  %v1082_v52 = vpop.f32.mrb[17].mxu0 }
 0x277   : > { %v1251_v53 = vrot.slane %v960_v50, 7 }
 0x279   : > { %v1253_v54 = vsel %vm768_vm0, %v1251_v53, %v1252_v49  ;;  %v1271_v56 = vsel %vm768_vm0, 0.0, %v1251_v53  ;;  %v1813_v57 = vpop.f32.mrb[10].mxu1  ;;  %v1857_v59 = vpop.f32.mrb[18].mxu0 }
 0x27a   : > { %v1307_v61 = vadd.f32 %v1271_v56, %v1082_v52  ;;  %v1255_v60 = vrot.slane %v1813_v57, 7  ;;  %v970_v62 = vpop.f32.mrb[11].mxu1  ;;  %v1092_v63 = vpop.f32.mrb[19].mxu0  ;;  %v1308_v0 = vadd.f32 %v1854_v48, %v1253_v54 }
 0x27b   : > { %v1254_v2 = vrot.slane %v970_v62, 7 }
 0x27d   : > { %v1256_v3 = vsel %vm768_vm0, %v1254_v2, %v1255_v60  ;;  %v1272_v5 = vsel %vm768_vm0, 0.0, %v1254_v2  ;;  %v1816_v6 = vpop.f32.mrb[12].mxu1  ;;  %v1860_v7 = vpop.f32.mrb[20].mxu0 }
 0x27e   : > { %v1309_v8 = vadd.f32 %v1272_v5, %v1092_v63  ;;  %v1258_v10 = vrot.slane %v1816_v6, 7  ;;  %v980_v13 = vpop.f32.mrb[13].mxu1  ;;  %v1102_v9 = vpop.f32.mrb[21].mxu0  ;;  %v1310_v11 = vadd.f32 %v1857_v59, %v1256_v3 }
 0x27f   : > { %v1257_v14 = vrot.slane %v980_v13, 7 }
 0x281   : > { %v1259_v15 = vsel %vm768_vm0, %v1257_v14, %v1258_v10  ;;  %v1273_v16 = vsel %vm768_vm0, 0.0, %v1257_v14  ;;  %v1819_v17 = vpop.f32.mrb[14].mxu1  ;;  %v1863_v18 = vpop.f32.mrb[22].mxu0 }
 0x282   : > { %v1311_v21 = vadd.f32 %v1273_v16, %v1102_v9  ;;  %v1261_v22 = vrot.slane %v1819_v17, 7  ;;  %v990_v23 = vpop.f32.mrb[15].mxu1  ;;  %v1112_v24 = vpop.f32.mrb[23].mxu0  ;;  %v1312_v29 = vadd.f32 %v1860_v7, %v1259_v15 }
 0x283   : > { %v1260_v37 = vrot.slane %v990_v23, 7 }
 0x285   : > { %v1262_v30 = vsel %vm768_vm0, %v1260_v37, %v1261_v22  ;;  %v1274_v19 = vsel %vm768_vm0, 0.0, %v1260_v37 }
 0x286   : > { %v1313_v27 = vadd.f32 %v1274_v19, %v1112_v24  ;;  %v1314_v31 = vadd.f32 %v1863_v18, %v1262_v30 }
 0x295   : > { %v1898_v33 = vpop.f32.mrb[16].mxu1 }
 0x296   : > { %v1284_v20 = vrot.slane %v1898_v33, 1  ;;  %v1204_v34 = vpop.f32.mrb[17].mxu1 }
 0x297   : > { %v1283_v35 = vrot.slane %v1204_v34, 1 }
 0x298   : > { %v1303_v36 = vsel %vm801_vm1, %v1284_v20, 0.0 }
 0x299   : > { %v1316_v28 = vadd.f32 %v1308_v0, %v1303_v36  ;;  %v1285_v38 = vsel %vm801_vm1, %v1283_v35, %v1284_v20  ;;  %v1901_v25 = vpop.f32.mrb[18].mxu1 }
 0x29a   : > { %v1315_v40 = vadd.f32 %v1307_v61, %v1285_v38  ;;  %v1287_v32 = vrot.slane %v1901_v25, 1  ;;  %v1214_v41 = vpop.f32.mrb[19].mxu1 }
 0x29b   : > { %v1324_v42 = vadd.f32 %v1316_v28, %v2580_v46  ;;  %v1286_v43 = vrot.slane %v1214_v41, 1 }
 0x29c   : > { %v1323_v39 = vadd.f32 %v1315_v40, %v2560_v26  ;;  %v1304_v44 = vsel %vm801_vm1, %v1287_v32, 0.0 }
 0x29d   : > { %1332 = vst [vmem:[%s2698_s22 + $0x8] sm:$0xff] %v1324_v42  ;;  %v1318_v45 = vadd.f32 %v1310_v11, %v1304_v44  ;;  %v1288_v47 = vsel %vm801_vm1, %v1286_v43, %v1287_v32  ;;  %v1904_v48 = vpop.f32.mrb[20].mxu1 }
 0x29e   : > { %1331 = vst [vmem:[%s2698_s22] sm:$0xff] %v1323_v39  ;;  %v1317_v49 = vadd.f32 %v1309_v8, %v1288_v47  ;;  %v1290_v46 = vrot.slane %v1904_v48, 1  ;;  %v1224_v50 = vpop.f32.mrb[21].mxu1 }
 0x29f   : > { %v1326_v26 = vadd.f32 %v1318_v45, %v2588_v55  ;;  %v1289_v52 = vrot.slane %v1224_v50, 1 }
 0x2a0   : > { %v1325_v53 = vadd.f32 %v1317_v49, %v2583_v51  ;;  %v1305_v54 = vsel %vm801_vm1, %v1290_v46, 0.0 }
 0x2a1   : > { %1334 = vst [vmem:[%s2698_s22 + $0x18] sm:$0xff] %v1326_v26  ;;  %v1320_v56 = vadd.f32 %v1312_v29, %v1305_v54  ;;  %v1291_v57 = vsel %vm801_vm1, %v1289_v52, %v1290_v46  ;;  %v1907_v59 = vpop.f32.mrb[22].mxu1 }
 0x2a2   : > { %1333 = vst [vmem:[%s2698_s22 + $0x10] sm:$0xff] %v1325_v53  ;;  %v1319_v61 = vadd.f32 %v1311_v21, %v1291_v57  ;;  %v1293_v60 = vrot.slane %v1907_v59, 1  ;;  %v1234_v62 = vpop.f32.mrb[23].mxu1 }
 0x2a3   : > { %v1328_v55 = vadd.f32 %v1320_v56, %v2601_v1  ;;  %v1292_v63 = vrot.slane %v1234_v62, 1 }
 0x2a4   : > { %v1327_v51 = vadd.f32 %v1319_v61, %v2593_v58  ;;  %v1306_v0 = vsel %vm801_vm1, %v1293_v60, 0.0  ;;  %1346 = sbr.rel (!%p2810_p9) target bundleno = 711 (0x2c7), region = 64 }
 0x2a5   : > { %1336 = vst [vmem:[%s2698_s22 + $0x28] sm:$0xff] %v1328_v55  ;;  %v1322_v2 = vadd.f32 %v1314_v31, %v1306_v0  ;;  %v1294_v3 = vsel %vm801_vm1, %v1292_v63, %v1293_v60 }
 0x2a6   : > { %1335 = vst [vmem:[%s2698_s22 + $0x20] sm:$0xff] %v1327_v51  ;;  %v1321_v5 = vadd.f32 %v1313_v27, %v1294_v3 }
 0x2a7   : > { %v1330_v6 = vadd.f32 %v1322_v2, %v2616_v12 }
 0x2a8   : > { %v1329_v7 = vadd.f32 %v1321_v5, %v2605_v4 }
 0x2a9   : > { %1338 = vst [vmem:[%s2698_s22 + $0x38] sm:$0xff] %v1330_v6 }
 0x2aa   : > { %1337 = vst [vmem:[%s2698_s22 + $0x30] sm:$0xff] %v1329_v7 }
 0x2ab   : > { %s2821_s16 = smov (!%p1349_p10, %s1348_s16), 4 }
 0x2ac   : > { %s2723_s30 = sshll.u32 %s2821_s16, 8 }
 0x2ad   : > { %s1354_s14 = ssub.s32 1024, %s2723_s30 }
 0x2ae   : > { %1355 = vsyncadd %s1340_s11, %s1354_s14  ;;  %p1482_p1 = scmp.ne.s32.totalorder %s2723_s30, 0  ;;  %s1497_s13 = sshll.u32 %s2393_s28, 10 }
 0x2af   : > { %s2733_s12 = scalar_lea.hbm %s2789_s7, %s1497_s13  ;;  %s1362_s15 = sshll.u32 %s2698_s22, 4  ;;  %s2736_s15 = int_to_ptr.vmem [resolvable:$true] %s1362_s15 }
 0x2b0   : > { %s2250_s18 = scalar_lea.vmem %s2736_s15, %s2723_s30  ;;  %s2329_s21 = smov [#allocation8]  }
 0x2b1   : > { %p2251_p3 = scmp.ne.s32.totalorder %s2736_s15, %s2250_s18  ;;  %s2254_s19 = sshll.u32 %s2329_s21, 4  ;;  %s2255_s19 = int_to_ptr.vmem [resolvable:$false] %s2254_s19 }
 0x2b2   : > { %s2256_s28 = scalar_lea.vmem %s2255_s19, 2048  ;;  %p2257_p11 = scmp.lt.s32.totalorder %s2736_s15, %s2255_s19 }
 0x2b3   : > { %p2252_p5 = pnand %p2251_p3, %p1482_p1  ;;  %p2258_p13 = scmp.lt.s32.totalorder %s2256_s28, %s2250_s18 }
 0x2b5   : > { %p2253_p6 = pneg %p2252_p5  ;;  %p2259_p0 = por %p2258_p13, %p2257_p11 }
 0x2b7   : > { %p2260_p12 = pnand %p2259_p0, %p2253_p6 }
 0x2b9   : > { %2263 = shalt.err (!%p2260_p12)
}
 0x2ba   : > { %s2264_s17 = scalar_lea.hbm %s2733_s12, %s2723_s30  ;;  %s2268_s22 = scalar_lea.hbm %s2789_s7, 1536 }
 0x2bb   : > { %p2265_p7 = scmp.ne.s32.totalorder %s2733_s12, %s2264_s17  ;;  %p2269_p9 = scmp.lt.u32.totalorder %s2733_s12, %s2789_s7 }
 0x2bc   : > { %p2270_p10 = scmp.lt.u32.totalorder %s2268_s22, %s2264_s17  ;;  %p2272_p5 = scmp.lt.u32.totalorder %s2264_s17, %s2733_s12 }
 0x2bd   : > { %p2266_p2 = pnand %p2265_p7, %p1482_p1 }
 0x2be   : > { %p2271_p3 = por %p2270_p10, %p2269_p9 }
 0x2bf   : > { %p2267_p8 = pneg %p2266_p2 }
 0x2c0   : > { %p2273_p6 = por %p2272_p5, %p2271_p3 }
 0x2c2   : > { %p2274_p11 = pnand %p2273_p6, %p2267_p8 }
 0x2c4   : > { %2277 = shalt.err (!%p2274_p11)
}
 0x2c5   : > { %s2330_s14 = smov 128   ;;  %s2331_s13 = smov 8  }
 0x2c6   : > { %1368 = dma.vmem_to_hbm [thread:$0]  (%p1482_p1), %s2736_s15, %s2723_s30, %s2733_s12, %s1340_s11, %s2330_s14, %s2330_s14, %s2331_s13  }
 0x2c7 PF: > { %s2811_s23 = sld [smem:[#allocation14_spill]]  ;;  %s1377_s29 = sand.u32 1, %s2308_s24  }
 0x2c8   : > { %s1378_s18 = scalar_lea.sflag [#allocation4], %s1377_s29 }
 0x2cd   : > { %p2812_p13 = scmp.ne.s32.totalorder %s2811_s23, 0 }
 0x2cf   : > { %p2118_p0 = pnand %p1458_p4, %p2812_p13 }
 0x2d1   : > { %2303 = dma.done.wait (!%p2118_p0), %s1378_s18, 1024  }
 0x2d2   : > { %2305 = vsyncadd (!%p2118_p0), %s1378_s18, 4294966272  ;;  %s2813_s27 = sld [smem:[#allocation12_spill]]  ;;  %s2814_s21 = sld [smem:[#allocation13_spill]] }
 0x2d3   : > { %s2815_s24 = smov %s2312_s25  ;;  %s2816_s25 = smov %s2316_s26 }
 0x2d8   : > { %p21_p12 = scmp.ge.s32.totalorder %s2813_s27, 4   ;;  %s2817_s26 = smov %s2814_s21 }
 0x2da   :  { %23 = sbr.rel (!%p21_p12) target bundleno = 6 (0x6), region = 105 }
 0x2e1   :  { %1383 = vsyncpa [#allocation3], 1 }
 0x2e2   :  { %1385 = vsyncpa [#allocation3 + $0x1], 1 }
 0x2e3   :  { %1386 = vsyncpa [#allocation6], 1 }
 0x2e4   :  { %1387 = vsyncpa [#allocation4], 1 }
 0x2e5   :  { %1389 = vsyncpa [#allocation4 + $0x1], 1 }

</bundles_post_ra>
